<compile_context>
chip_gen: v6e
topology: v6e:2x2x1
jax: 0.10.0
libtpu: 0.0.40
codegen_flags: <defaults>
</compile_context>

<pallas_src>
import jax
import jax.numpy as jnp
from jax.experimental import pallas as pl
from jax.experimental.pallas import tpu as pltpu


def _round_up(x, m):
    return (x + m - 1) // m * m


# --------------------------- kernels ---------------------------------------

def _gemm_bias_kernel(p_ref, w_ref, b_ref, o_ref):
    """Single-K-block GEMM + fused bias: o = p @ w + b (no scratch, no revisit)."""
    acc = jnp.dot(p_ref[...], w_ref[...], preferred_element_type=jnp.float32)
    o_ref[...] = (acc + b_ref[...]).astype(o_ref.dtype)


def _gemm_bias_kred_kernel(p_ref, w_ref, b_ref, o_ref, acc_ref):
    """K-tiled GEMM with f32 VMEM accumulator; bias fused at the last K step."""
    k = pl.program_id(2)

    @pl.when(k == 0)
    def _():
        acc_ref[...] = jnp.zeros_like(acc_ref)

    # bf16 x bf16 -> f32 accumulate on the MXU.
    acc_ref[...] += jnp.dot(p_ref[...], w_ref[...],
                            preferred_element_type=jnp.float32)

    @pl.when(k == pl.num_programs(2) - 1)
    def _():
        o_ref[...] = (acc_ref[...] + b_ref[...]).astype(o_ref.dtype)


# --------------------------- pallas_call wrappers ---------------------------

_K_SINGLE_BLOCK_MAX = 4096  # bf16 K-slab still fits VMEM comfortably at tm<=512


def _patch_embed_gemm(patches_bf16, w_bf16, bias_f32, out_dtype, tm, tn, tk):
    M, K = patches_bf16.shape
    _, N = w_bf16.shape

    if tk == K:
        # 2-D grid, whole K per block: no accumulator, fewer grid steps.
        return pl.pallas_call(
            _gemm_bias_kernel,
            out_shape=jax.ShapeDtypeStruct((M, N), out_dtype),
            grid=(M // tm, N // tn),
            in_specs=[
                pl.BlockSpec((tm, K), lambda i, j: (i, 0)),   # patches
                pl.BlockSpec((K, tn), lambda i, j: (0, j)),   # weight (K, E)
                pl.BlockSpec((1, tn), lambda i, j: (0, j)),   # bias
            ],
            out_specs=pl.BlockSpec((tm, tn), lambda i, j: (i, j)),
            compiler_params=pltpu.CompilerParams(
                dimension_semantics=("parallel", "parallel")),
        )(patches_bf16, w_bf16, bias_f32)

    # Fallback: K-reduction grid axis with VMEM accumulator.
    return pl.pallas_call(
        _gemm_bias_kred_kernel,
        out_shape=jax.ShapeDtypeStruct((M, N), out_dtype),
        grid=(M // tm, N // tn, K // tk),
        in_specs=[
            pl.BlockSpec((tm, tk), lambda i, j, k: (i, k)),   # patches
            pl.BlockSpec((tk, tn), lambda i, j, k: (k, j)),   # weight (K, E)
            pl.BlockSpec((1, tn), lambda i, j, k: (0, j)),    # bias
        ],
        out_specs=pl.BlockSpec((tm, tn), lambda i, j, k: (i, j)),
        scratch_shapes=[pltpu.VMEM((tm, tn), jnp.float32)],
        compiler_params=pltpu.CompilerParams(
            dimension_semantics=("parallel", "parallel", "arbitrary")),
    )(patches_bf16, w_bf16, bias_f32)


def patch_embed_pallas(x, w, b, *, patch=32):
    """x: (B, C, H, W); w: (E, C, P, P) (PyTorch Conv2d layout); b: (E,)."""
    B, C, H, W = x.shape
    E = w.shape[0]
    P = patch
    Hp = (H - P) // P + 1
    Wp = (W - P) // P + 1

    # --- im2col: pure layout work, kept outside the kernel, done in bf16 ----
    xc = x[:, :, :Hp * P, :Wp * P].astype(jnp.bfloat16)
    patches = xc.reshape(B, C, Hp, P, Wp, P).transpose(0, 2, 4, 1, 3, 5)
    patches = patches.reshape(B * Hp * Wp, C * P * P)            # (M, K)
    wk = w.astype(jnp.bfloat16).reshape(E, C * P * P).T          # (K, E)

    M, K = patches.shape
    N = E

    # --- tile selection: multiples of (8, 128), batch folded into M ---------
    tm = min(512, _round_up(M, 8))
    n128 = _round_up(N, 128)
    tn = 256 if n128 % 256 == 0 else 128
    k128 = _round_up(K, 128)
    tk = k128 if k128 <= _K_SINGLE_BLOCK_MAX else 2048

    M_pad = _round_up(M, tm)
    N_pad = n128
    K_pad = _round_up(k128, tk)

    patches_b = jnp.pad(patches, ((0, M_pad - M), (0, K_pad - K)))
    w_b = jnp.pad(wk, ((0, K_pad - K), (0, N_pad - N)))
    bias_b = jnp.pad(b.astype(jnp.float32), (0, N_pad - N)).reshape(1, N_pad)

    out = _patch_embed_gemm(patches_b, w_b, bias_b, x.dtype, tm, tn, tk)
    out = out[:M, :N].reshape(B, Hp * Wp, E)
    # norm_layer=None in the module -> nn.Identity(): nothing to emit.
    return out


# --------------------------- references -------------------------------------

def patch_embed_reference(x, w, b, *, patch=32):
    """Exact f32 conv reference (module semantics)."""
    out = jax.lax.conv_general_dilated(
        x, w, window_strides=(patch, patch), padding="VALID",
        dimension_numbers=("NCHW", "OIHW", "NCHW"),
        precision=jax.lax.Precision.HIGHEST)
    out = out + b.reshape(1, -1, 1, 1)
    B, E, Hp, Wp = out.shape
    return out.reshape(B, E, Hp * Wp).transpose(0, 2, 1)


def patch_embed_reference_bf16(x, w, b, *, patch=32):
    """Same numeric recipe as the kernel (bf16 operands, f32 accumulate)."""
    B, C, H, W = x.shape
    E = w.shape[0]
    P = patch
    Hp, Wp = (H - P) // P + 1, (W - P) // P + 1
    xc = x[:, :, :Hp * P, :Wp * P]
    patches = xc.reshape(B, C, Hp, P, Wp, P).transpose(0, 2, 4, 1, 3, 5)
    patches = patches.reshape(B * Hp * Wp, C * P * P)
    wk = w.reshape(E, C * P * P).T
    y = jnp.dot(patches.astype(jnp.bfloat16).astype(jnp.float32),
                wk.astype(jnp.bfloat16).astype(jnp.float32),
                precision=jax.lax.Precision.HIGHEST) + b.astype(jnp.float32)
    return y.reshape(B, Hp * Wp, E).astype(x.dtype)


if __name__ == "__main__":
    # Small, module-consistent config: img_size=64, conv kernel/stride=32,
    # in_c=3, embed_dim=128  ->  x: (2, 3, 64, 64), output: (2, 4, 128).
    B, C_in, IMG, P, E = 2, 3, 64, 32, 128

    key = jax.random.PRNGKey(0)
    kx, kw, kb = jax.random.split(key, 3)
    x = jax.random.normal(kx, (B, C_in, IMG, IMG), dtype=jnp.float32)
    w = jax.random.normal(kw, (E, C_in, P, P), dtype=jnp.float32) * 0.02
    b = jax.random.normal(kb, (E,), dtype=jnp.float32) * 0.02

    out = patch_embed_pallas(x, w, b, patch=P)
    jax.block_until_ready(out)

    assert out.shape == (B, (IMG // P) ** 2, E), out.shape

    # Tight check vs. the identical bf16-operand / f32-accumulate recipe.
    ref_bf16 = patch_embed_reference_bf16(x, w, b, patch=P)
    assert jnp.allclose(out, ref_bf16, atol=2e-3, rtol=2e-3)

    # Loose check vs. the exact f32 conv (difference is bf16 input rounding).
    ref_f32 = patch_embed_reference(x, w, b, patch=P)
    assert jnp.allclose(out, ref_f32, atol=5e-2, rtol=5e-2)

    print("KERNEL_OK")
</pallas_src>

<mosaic_0001>
module attributes {stable_mosaic.version = 11 : i64} {
  func.func @_gemm_bias_kernel(%arg0: i32, %arg1: i32, %arg2: memref<8x3072xbf16, #tpu.memory_space<vmem>>, %arg3: memref<3072x128xbf16, #tpu.memory_space<vmem>>, %arg4: memref<1x128xf32, #tpu.memory_space<vmem>>, %arg5: memref<8x128xf32, #tpu.memory_space<vmem>>) attributes {dimension_semantics = [#tpu.dimension_semantics<parallel>, #tpu.dimension_semantics<parallel>], iteration_bounds = array<i64: 1, 1>, scalar_prefetch = 0 : i64, scratch_operands = 0 : i64, tpu.core_type = #tpu.core_type<tc>, window_params = [{transform_indices = @transform_0, window_bounds = array<i64: 8, 3072>}, {transform_indices = @transform_1, window_bounds = array<i64: 3072, 128>}, {transform_indices = @transform_2, window_bounds = array<i64: 1, 128>}, {transform_indices = @transform_3, window_bounds = array<i64: 8, 128>}]} {
    %c0 = arith.constant 0 : index
    %c0_0 = arith.constant 0 : index
    %0 = vector.load %arg2[%c0, %c0_0] : memref<8x3072xbf16, #tpu.memory_space<vmem>>, vector<8x3072xbf16>
    %c0_1 = arith.constant 0 : index
    %c0_2 = arith.constant 0 : index
    %1 = vector.load %arg3[%c0_1, %c0_2] : memref<3072x128xbf16, #tpu.memory_space<vmem>>, vector<3072x128xbf16>
    %cst = arith.constant dense<0.000000e+00> : vector<8x128xf32>
    %2 = tpu.matmul %0, %1, %cst {dimension_numbers = #tpu.dot_dimension_numbers<[1], [0], [0], [1], [0, 0, 1, 1], [], []>} : vector<8x3072xbf16>, vector<3072x128xbf16>, vector<8x128xf32> -> vector<8x128xf32>
    %c0_3 = arith.constant 0 : index
    %c0_4 = arith.constant 0 : index
    %3 = vector.load %arg4[%c0_3, %c0_4] : memref<1x128xf32, #tpu.memory_space<vmem>>, vector<1x128xf32>
    %4 = vector.broadcast %3 : vector<1x128xf32> to vector<8x128xf32>
    %5 = arith.addf %2, %4 : vector<8x128xf32>
    %c0_5 = arith.constant 0 : index
    %c0_6 = arith.constant 0 : index
    %6 = vector.load %arg5[%c0_5, %c0_6] : memref<8x128xf32, #tpu.memory_space<vmem>>, vector<8x128xf32>
    tpu.vector_store %arg5[%c0_5, %c0_6], %5 {strides = array<i32>} : memref<8x128xf32, #tpu.memory_space<vmem>>, vector<8x128xf32>,
    return
  }
  func.func @transform_0(%arg0: i32, %arg1: i32) -> (i32, i32) {
    %c0_i32 = arith.constant 0 : i32
    %c0_i32_0 = arith.constant 0 : i32
    return %arg0, %c0_i32 : i32, i32
  }
  func.func @transform_1(%arg0: i32, %arg1: i32) -> (i32, i32) {
    %c0_i32 = arith.constant 0 : i32
    %c0_i32_0 = arith.constant 0 : i32
    return %c0_i32, %arg1 : i32, i32
  }
  func.func @transform_2(%arg0: i32, %arg1: i32) -> (i32, i32) {
    %c0_i32 = arith.constant 0 : i32
    %c0_i32_0 = arith.constant 0 : i32
    return %c0_i32, %arg1 : i32, i32
  }
  func.func @transform_3(%arg0: i32, %arg1: i32) -> (i32, i32) {
    %c0_i32 = arith.constant 0 : i32
    return %arg0, %arg1 : i32, i32
  }
}

</mosaic_0001>

<bundles_post_ra>
// kernel: tpu_custom_call.1
= control target key start
LH: loop header
LB: loop body
LE: loop exit
PB: predicated region body
PF: predicated region fallthrough
CT: control target
= control target key end

     0   :  { %8 = vsyncpa [#allocation3], 0  ;;  %s2983_s0 = inlined_call_operand.hbm [shape: bf16[8,3072], index: 0, kind: input, shape index: {}]   ;;  %s2984_s1 = inlined_call_operand.hbm [shape: bf16[3072,128], index: 1, kind: input, shape index: {}]   ;;  %s2985_s2 = inlined_call_operand.vmem [shape: f32[1,128], index: 2, kind: input, shape index: {}]   ;;  %s2986_s3 = inlined_call_operand.hbm [shape: f32[8,128], index: 3, kind: output, shape index: {}]  }
   0x1   :  { %9 = vsyncpa [#allocation6], 0 }
   0x2   :  { %10 = vsyncpa [#allocation4], 0  ;;  %s2946_s12 = smov [#allocation2]   ;;  %s2947_s14 = smov [#allocation5]  }
   0x3   :  { %s17_s13 = sshll.u32 %s2946_s12, 4  ;;  %s26_s15 = sshll.u32 %s2947_s14, 4  ;;  %s18_s13 = int_to_ptr.vmem [resolvable:$true] %s17_s13  ;;  %s27_s15 = int_to_ptr.vmem [resolvable:$true] %s26_s15 }
   0x4   :  { %s2888_s16 = scalar_lea.vmem %s18_s13, 1536  ;;  %p2893_p1 = scmp.lt.s32.totalorder %s18_s13, %s18_s13 }
   0x5   :  { %p2889_p0 = scmp.ne.s32.totalorder %s18_s13, %s2888_s16  ;;  %p2894_p2 = scmp.lt.s32.totalorder %s2888_s16, %s2888_s16 }
   0x7   :  { %p2895_p3 = por %p2894_p2, %p2893_p1 }
   0x9   :  { %p2896_p4 = pnand %p2895_p3, %p2889_p0 }
   0xb   :  { %2899 = shalt.err (!%p2896_p4)
}
   0xc   :  { %20 = dma.hbm_to_vmem [thread:$0]  %s2983_s0, 1536, %s18_s13, [#allocation3]  }
   0xd   :  { %s2908_s19 = scalar_lea.vmem %s27_s15, 24576  ;;  %p2913_p6 = scmp.lt.s32.totalorder %s27_s15, %s27_s15 }
   0xe   :  { %p2909_p5 = scmp.ne.s32.totalorder %s27_s15, %s2908_s19  ;;  %p2914_p7 = scmp.lt.s32.totalorder %s2908_s19, %s2908_s19 }
  0x10   :  { %p2915_p8 = por %p2914_p7, %p2913_p6 }
  0x12   :  { %p2916_p9 = pnand %p2915_p8, %p2909_p5 }
  0x14   :  { %2919 = shalt.err (!%p2916_p9)
}
  0x15   :  { %s2948_s20 = smov 64   ;;  %s2949_s21 = smov 4  }
  0x16   :  { %32 = dma.hbm_to_vmem [thread:$0]  %s2984_s1, 24576, %s27_s15, [#allocation6], %s2948_s20, %s2948_s20, %s2949_s21  }
  0x17   :  { %2940 = dma.done.wait [#allocation3], 1536  }
  0x18   :  { %2941 = vsyncadd [#allocation3], 4294965760 }
  0x19   :  { %2942 = dma.done.wait [#allocation6], 24576  }
  0x1a   :  { %2943 = vsyncadd [#allocation6], 4294942720  ;;  %v2664_v0 = vld [vmem:[#allocation5 + $0x78] sm:$0xff]   ;;  %v2668_v4 = vld [vmem:[#allocation5 + $0x70] sm:$0xff]  }
  0x1b   :  { %v2665_v1 = vld [vmem:[#allocation5 + $0xf8] sm:$0xff]   ;;  %2395 = vmatprep.subr.bf16.mxu0 %v2664_v0  ;;  %v2669_v5 = vld [vmem:[#allocation5 + $0xf0] sm:$0xff]   ;;  %v2672_v8 = vld [vmem:[#allocation5 + $0x68] sm:$0xff]  }
  0x1c   :  { %v2666_v2 = vld [vmem:[#allocation5 + $0x38] sm:$0xff]   ;;  %2417 = vmatprep.subr.bf16.mxu1 %v2665_v1  ;;  %v2670_v6 = vld [vmem:[#allocation5 + $0x30] sm:$0xff]   ;;  %v2673_v9 = vld [vmem:[#allocation5 + $0xe8] sm:$0xff]  }
  0x1d   :  { %v2667_v3 = vld [vmem:[#allocation5 + $0xb8] sm:$0xff]   ;;  %2396 = vmatpush3.bf16.msra.mxu0 %v2666_v2  ;;  %v2671_v7 = vld [vmem:[#allocation5 + $0xb0] sm:$0xff]   ;;  %v2674_v10 = vld [vmem:[#allocation5 + $0x28] sm:$0xff]  }
  0x1e   :  { %2418 = vmatpush3.bf16.msra.mxu1 %v2667_v3  ;;  %2397 = vmatprep.subr.bf16.mxu0 %v2668_v4  ;;  %v2675_v11 = vld [vmem:[#allocation5 + $0xa8] sm:$0xff]   ;;  %v2676_v12 = vld [vmem:[#allocation5 + $0x60] sm:$0xff]   ;;  %v2680_v16 = vld [vmem:[#allocation5 + $0x58] sm:$0xff]  }
  0x1f   :  { %2419 = vmatprep.subr.bf16.mxu1 %v2669_v5  ;;  %v2677_v13 = vld [vmem:[#allocation5 + $0xe0] sm:$0xff]   ;;  %v2681_v17 = vld [vmem:[#allocation5 + $0xd8] sm:$0xff]   ;;  %v2684_v20 = vld [vmem:[#allocation5 + $0x50] sm:$0xff]  }
  0x20   :  { %v2678_v14 = vld [vmem:[#allocation5 + $0x20] sm:$0xff]   ;;  %v2682_v18 = vld [vmem:[#allocation5 + $0x18] sm:$0xff]   ;;  %v2685_v21 = vld [vmem:[#allocation5 + $0xd0] sm:$0xff]  }
  0x21   :  { %2398 = vmatpush3.bf16.msra.mxu0 %v2670_v6  ;;  %v2679_v15 = vld [vmem:[#allocation5 + $0xa0] sm:$0xff]   ;;  %v2683_v19 = vld [vmem:[#allocation5 + $0x98] sm:$0xff]   ;;  %v2686_v22 = vld [vmem:[#allocation5 + $0x10] sm:$0xff]  }
  0x22   :  { %2420 = vmatpush3.bf16.msra.mxu1 %v2671_v7  ;;  %2399 = vmatprep.subr.bf16.mxu0 %v2672_v8  ;;  %v2687_v23 = vld [vmem:[#allocation5 + $0x90] sm:$0xff]   ;;  %v2688_v24 = vld [vmem:[#allocation5 + $0x48] sm:$0xff]   ;;  %v2692_v28 = vld [vmem:[#allocation5 + $0x40] sm:$0xff]  }
  0x23   :  { %2421 = vmatprep.subr.bf16.mxu1 %v2673_v9  ;;  %v2689_v25 = vld [vmem:[#allocation5 + $0xc8] sm:$0xff]   ;;  %v2693_v29 = vld [vmem:[#allocation5 + $0xc0] sm:$0xff]   ;;  %v2700_v38 = vld [vmem:[#allocation5 + $0x178] sm:$0xff]  }
  0x24   :  { %v2690_v26 = vld [vmem:[#allocation5 + $0x8] sm:$0xff]   ;;  %v2694_v30 = vld [vmem:[#allocation5] sm:$0xff]   ;;  %v2701_v39 = vld [vmem:[#allocation5 + $0x1f8] sm:$0xff]  }
  0x25   :  { %2400 = vmatpush3.bf16.msra.mxu0 %v2674_v10  ;;  %v2691_v27 = vld [vmem:[#allocation5 + $0x88] sm:$0xff]   ;;  %v2695_v31 = vld [vmem:[#allocation5 + $0x80] sm:$0xff]   ;;  %v2702_v40 = vld [vmem:[#allocation5 + $0x138] sm:$0xff]  }
  0x26   :  { %2422 = vmatpush3.bf16.msra.mxu1 %v2675_v11  ;;  %2401 = vmatprep.subr.bf16.mxu0 %v2676_v12  ;;  %v42_v32 = vld [vmem:[#allocation2] sm:$0xff]  ;;  %v43_v33 = vld [vmem:[#allocation2 + $0x8] sm:$0xff]  ;;  %v2703_v41 = vld [vmem:[#allocation5 + $0x1b8] sm:$0xff]  }
  0x27   :  { %2423 = vmatprep.subr.bf16.mxu1 %v2677_v13  ;;  %v2179_v34 = vcombine.low %v42_v32, %v42_v32  ;;  %v2180_v35 = vcombine.high %v42_v32, %v42_v32  ;;  %v2181_v36 = vcombine.low %v43_v33, %v43_v33  ;;  %v2182_v37 = vcombine.high %v43_v33, %v43_v33  ;;  %v2704_v42 = vld [vmem:[#allocation5 + $0x170] sm:$0xff]   ;;  %v2708_v46 = vld [vmem:[#allocation5 + $0x168] sm:$0xff]   ;;  %v2712_v50 = vld [vmem:[#allocation5 + $0x160] sm:$0xff]  }
  0x28   :  { %v2705_v43 = vld [vmem:[#allocation5 + $0x1f0] sm:$0xff]   ;;  %v2709_v47 = vld [vmem:[#allocation5 + $0x1e8] sm:$0xff]   ;;  %v2713_v51 = vld [vmem:[#allocation5 + $0x1e0] sm:$0xff]  }
  0x29   :  { %2402 = vmatpush3.bf16.msra.mxu0 %v2678_v14  ;;  %1713 = vmatprep.mubr.bf16.mxu0 %v2180_v35  ;;  %v2706_v44 = vld [vmem:[#allocation5 + $0x130] sm:$0xff]   ;;  %v2710_v48 = vld [vmem:[#allocation5 + $0x128] sm:$0xff]   ;;  %v2714_v52 = vld [vmem:[#allocation5 + $0x120] sm:$0xff]  }
  0x2a   :  { %2424 = vmatpush3.bf16.msra.mxu1 %v2679_v15  ;;  %2403 = vmatprep.subr.bf16.mxu0 %v2680_v16  ;;  %v2707_v45 = vld [vmem:[#allocation5 + $0x1b0] sm:$0xff]   ;;  %v2711_v49 = vld [vmem:[#allocation5 + $0x1a8] sm:$0xff]   ;;  %v2715_v53 = vld [vmem:[#allocation5 + $0x1a0] sm:$0xff]  }
  0x2b   :  { %2425 = vmatprep.subr.bf16.mxu1 %v2681_v17  ;;  %1753 = vmatprep.mubr.bf16.mxu1 %v2182_v37  ;;  %v2716_v54 = vld [vmem:[#allocation5 + $0x158] sm:$0xff]   ;;  %v2720_v58 = vld [vmem:[#allocation5 + $0x150] sm:$0xff]   ;;  %v2724_v62 = vld [vmem:[#allocation5 + $0x148] sm:$0xff]  }
  0x2c   :  { %v2717_v55 = vld [vmem:[#allocation5 + $0x1d8] sm:$0xff]   ;;  %v2721_v59 = vld [vmem:[#allocation5 + $0x1d0] sm:$0xff]   ;;  %v2725_v63 = vld [vmem:[#allocation5 + $0x1c8] sm:$0xff]  }
  0x2d   :  { %2404 = vmatpush3.bf16.msra.mxu0 %v2682_v18  ;;  %v2718_v56 = vld [vmem:[#allocation5 + $0x118] sm:$0xff]   ;;  %v2722_v60 = vld [vmem:[#allocation5 + $0x110] sm:$0xff]   ;;  %v2726_v0 = vld [vmem:[#allocation5 + $0x108] sm:$0xff]  }
  0x2e   :  { %2426 = vmatpush3.bf16.msra.mxu1 %v2683_v19  ;;  %2405 = vmatprep.subr.bf16.mxu0 %v2684_v20  ;;  %v2719_v57 = vld [vmem:[#allocation5 + $0x198] sm:$0xff]   ;;  %v2723_v61 = vld [vmem:[#allocation5 + $0x190] sm:$0xff]   ;;  %v2727_v1 = vld [vmem:[#allocation5 + $0x188] sm:$0xff]  }
  0x2f   :  { %2427 = vmatprep.subr.bf16.mxu1 %v2685_v21  ;;  %v2728_v2 = vld [vmem:[#allocation5 + $0x140] sm:$0xff]   ;;  %v44_v6 = vld [vmem:[#allocation2 + $0x10] sm:$0xff]  ;;  %v45_v9 = vld [vmem:[#allocation2 + $0x18] sm:$0xff] }
  0x30   :  { %v2729_v3 = vld [vmem:[#allocation5 + $0x1c0] sm:$0xff]   ;;  %v2183_v7 = vcombine.low %v44_v6, %v44_v6  ;;  %v2184_v8 = vcombine.high %v44_v6, %v44_v6  ;;  %v2185_v10 = vcombine.low %v45_v9, %v45_v9  ;;  %v2186_v11 = vcombine.high %v45_v9, %v45_v9  ;;  %v2736_v12 = vld [vmem:[#allocation5 + $0x278] sm:$0xff]   ;;  %v2740_v16 = vld [vmem:[#allocation5 + $0x270] sm:$0xff]  }
  0x31   :  { %2406 = vmatpush3.bf16.msra.mxu0 %v2686_v22  ;;  %v2730_v4 = vld [vmem:[#allocation5 + $0x100] sm:$0xff]   ;;  %v2737_v13 = vld [vmem:[#allocation5 + $0x2f8] sm:$0xff]   ;;  %v2741_v17 = vld [vmem:[#allocation5 + $0x2f0] sm:$0xff]  }
  0x32   :  { %2428 = vmatpush3.bf16.msra.mxu1 %v2687_v23  ;;  %2407 = vmatprep.subr.bf16.mxu0 %v2688_v24  ;;  %v2731_v5 = vld [vmem:[#allocation5 + $0x180] sm:$0xff]   ;;  %v2738_v14 = vld [vmem:[#allocation5 + $0x238] sm:$0xff]   ;;  %v2742_v18 = vld [vmem:[#allocation5 + $0x230] sm:$0xff]  }
  0x33   :  { %2429 = vmatprep.subr.bf16.mxu1 %v2689_v25  ;;  %v2739_v15 = vld [vmem:[#allocation5 + $0x2b8] sm:$0xff]   ;;  %v2743_v19 = vld [vmem:[#allocation5 + $0x2b0] sm:$0xff]   ;;  %v2744_v20 = vld [vmem:[#allocation5 + $0x268] sm:$0xff]  }
  0x34   :  { %v2745_v21 = vld [vmem:[#allocation5 + $0x2e8] sm:$0xff]   ;;  %v2748_v24 = vld [vmem:[#allocation5 + $0x260] sm:$0xff]   ;;  %v2756_v32 = vld [vmem:[#allocation5 + $0x250] sm:$0xff]  }
  0x35   :  { %2408 = vmatpush3.bf16.msra.mxu0 %v2690_v26  ;;  %v2746_v22 = vld [vmem:[#allocation5 + $0x228] sm:$0xff]   ;;  %v2749_v25 = vld [vmem:[#allocation5 + $0x2e0] sm:$0xff]   ;;  %v2757_v33 = vld [vmem:[#allocation5 + $0x2d0] sm:$0xff]  }
  0x36   :  { %2430 = vmatpush3.bf16.msra.mxu1 %v2691_v27  ;;  %2409 = vmatprep.subr.bf16.mxu0 %v2692_v28  ;;  %v2747_v23 = vld [vmem:[#allocation5 + $0x2a8] sm:$0xff]   ;;  %v2750_v26 = vld [vmem:[#allocation5 + $0x220] sm:$0xff]   ;;  %v2752_v28 = vld [vmem:[#allocation5 + $0x258] sm:$0xff]  }
  0x37   :  { %2431 = vmatprep.subr.bf16.mxu1 %v2693_v29  ;;  %v2751_v27 = vld [vmem:[#allocation5 + $0x2a0] sm:$0xff]   ;;  %v2753_v29 = vld [vmem:[#allocation5 + $0x2d8] sm:$0xff]   ;;  %v2759_v35 = vld [vmem:[#allocation5 + $0x290] sm:$0xff]  }
  0x38   :  { %v2761_v37 = vld [vmem:[#allocation5 + $0x2c8] sm:$0xff]   ;;  %v2792_v6 = vld [vmem:[#allocation5 + $0x350] sm:$0xff]  }
  0x39   :  { %2410 = vmatpush3.bf16.msra.mxu0 %v2694_v30  ;;  %v2754_v30 = vld [vmem:[#allocation5 + $0x218] sm:$0xff]   ;;  %v2795_v9 = vld [vmem:[#allocation5 + $0x390] sm:$0xff]  }
  0x3a   :  { %2432 = vmatpush3.bf16.msra.mxu1 %v2695_v31  ;;  %2439 = vmatprep.subr.bf16.mxu0 %v2700_v38  ;;  %v2755_v31 = vld [vmem:[#allocation5 + $0x298] sm:$0xff]   ;;  %v2762_v38 = vld [vmem:[#allocation5 + $0x208] sm:$0xff]  }
  0x3b   :  { %2461 = vmatprep.subr.bf16.mxu1 %v2701_v39  ;;  %v2763_v39 = vld [vmem:[#allocation5 + $0x288] sm:$0xff]  }
  0x3c   :  { %1714 = vmatmul.mubr.bf16.vlgmr.msra.gmra.mxu0 %v2179_v34  ;;  %v2758_v34 = vld [vmem:[#allocation5 + $0x210] sm:$0xff]  }
  0x3d   :  { %1754 = vmatmul.mubr.bf16.vlgmr.msra.gmra.mxu1 %v2181_v36  ;;  %2440 = vmatpush3.bf16.msra.mxu0 %v2702_v40  ;;  %v2760_v36 = vld [vmem:[#allocation5 + $0x248] sm:$0xff]   ;;  %v2764_v40 = vld [vmem:[#allocation5 + $0x240] sm:$0xff]  }
  0x3e   :  { %2462 = vmatpush3.bf16.msra.mxu1 %v2703_v41  ;;  %2441 = vmatprep.subr.bf16.mxu0 %v2704_v42  ;;  %v2765_v41 = vld [vmem:[#allocation5 + $0x2c0] sm:$0xff]  }
  0x3f   :  { %2463 = vmatprep.subr.bf16.mxu1 %v2705_v43  ;;  %1793 = vmatprep.mubr.bf16.mxu0 %v2184_v8  ;;  %v2766_v42 = vld [vmem:[#allocation5 + $0x200] sm:$0xff]   ;;  %v2794_v8 = vld [vmem:[#allocation5 + $0x310] sm:$0xff]  }
  0x40   :  { %1833 = vmatprep.mubr.bf16.mxu1 %v2186_v11  ;;  %v2767_v43 = vld [vmem:[#allocation5 + $0x280] sm:$0xff]   ;;  %v2797_v11 = vld [vmem:[#allocation5 + $0x3c8] sm:$0xff]  }
  0x41   :  { %2442 = vmatpush3.bf16.msra.mxu0 %v2706_v44  ;;  %v46_v44 = vld [vmem:[#allocation2 + $0x20] sm:$0xff] }
  0x42   :  { %2464 = vmatpush3.bf16.msra.mxu1 %v2707_v45  ;;  %2443 = vmatprep.subr.bf16.mxu0 %v2708_v46  ;;  %v47_v45 = vld [vmem:[#allocation2 + $0x28] sm:$0xff]  ;;  %v2187_v46 = vcombine.low %v46_v44, %v46_v44 }
  0x43   :  { %2465 = vmatprep.subr.bf16.mxu1 %v2709_v47  ;;  %v2188_v47 = vcombine.high %v46_v44, %v46_v44  ;;  %v2828_v44 = vld [vmem:[#allocation5 + $0x450] sm:$0xff]  }
  0x45   :  { %2444 = vmatpush3.bf16.msra.mxu0 %v2710_v48  ;;  %v2189_v48 = vcombine.low %v47_v45, %v47_v45 }
  0x46   :  { %2466 = vmatpush3.bf16.msra.mxu1 %v2711_v49  ;;  %2445 = vmatprep.subr.bf16.mxu0 %v2712_v50  ;;  %v2190_v49 = vcombine.high %v47_v45, %v47_v45  ;;  %v2772_v50 = vld [vmem:[#allocation5 + $0x378] sm:$0xff]   ;;  %v2829_v45 = vld [vmem:[#allocation5 + $0x4d0] sm:$0xff]  }
  0x47   :  { %2467 = vmatprep.subr.bf16.mxu1 %v2713_v51  ;;  %v2773_v51 = vld [vmem:[#allocation5 + $0x3f8] sm:$0xff]  }
  0x49   :  { %2446 = vmatpush3.bf16.msra.mxu0 %v2714_v52  ;;  %v2774_v52 = vld [vmem:[#allocation5 + $0x338] sm:$0xff]  }
  0x4a   :  { %2468 = vmatpush3.bf16.msra.mxu1 %v2715_v53  ;;  %2447 = vmatprep.subr.bf16.mxu0 %v2716_v54  ;;  %v2775_v53 = vld [vmem:[#allocation5 + $0x3b8] sm:$0xff]   ;;  %v2776_v54 = vld [vmem:[#allocation5 + $0x370] sm:$0xff]  }
  0x4b   :  { %2469 = vmatprep.subr.bf16.mxu1 %v2717_v55  ;;  %v2777_v55 = vld [vmem:[#allocation5 + $0x3f0] sm:$0xff]  }
  0x4d   :  { %2448 = vmatpush3.bf16.msra.mxu0 %v2718_v56  ;;  %v2778_v56 = vld [vmem:[#allocation5 + $0x330] sm:$0xff]  }
  0x4e   :  { %2470 = vmatpush3.bf16.msra.mxu1 %v2719_v57  ;;  %2449 = vmatprep.subr.bf16.mxu0 %v2720_v58  ;;  %v2779_v57 = vld [vmem:[#allocation5 + $0x3b0] sm:$0xff]   ;;  %v2780_v58 = vld [vmem:[#allocation5 + $0x368] sm:$0xff]  }
  0x4f   :  { %2471 = vmatprep.subr.bf16.mxu1 %v2721_v59  ;;  %v2781_v59 = vld [vmem:[#allocation5 + $0x3e8] sm:$0xff]  }
  0x51   :  { %2450 = vmatpush3.bf16.msra.mxu0 %v2722_v60  ;;  %v2782_v60 = vld [vmem:[#allocation5 + $0x328] sm:$0xff]  }
  0x52   :  { %2472 = vmatpush3.bf16.msra.mxu1 %v2723_v61  ;;  %2451 = vmatprep.subr.bf16.mxu0 %v2724_v62  ;;  %v2783_v61 = vld [vmem:[#allocation5 + $0x3a8] sm:$0xff]   ;;  %v2784_v62 = vld [vmem:[#allocation5 + $0x360] sm:$0xff]  }
  0x53   :  { %2473 = vmatprep.subr.bf16.mxu1 %v2725_v63  ;;  %v2785_v63 = vld [vmem:[#allocation5 + $0x3e0] sm:$0xff]  }
  0x55   :  { %2452 = vmatpush3.bf16.msra.mxu0 %v2726_v0  ;;  %v2786_v0 = vld [vmem:[#allocation5 + $0x320] sm:$0xff]  }
  0x56   :  { %2474 = vmatpush3.bf16.msra.mxu1 %v2727_v1  ;;  %2453 = vmatprep.subr.bf16.mxu0 %v2728_v2  ;;  %v2787_v1 = vld [vmem:[#allocation5 + $0x3a0] sm:$0xff]   ;;  %v2788_v2 = vld [vmem:[#allocation5 + $0x358] sm:$0xff]  }
  0x57   :  { %2475 = vmatprep.subr.bf16.mxu1 %v2729_v3  ;;  %v2789_v3 = vld [vmem:[#allocation5 + $0x3d8] sm:$0xff]  }
  0x59   :  { %2454 = vmatpush3.bf16.msra.mxu0 %v2730_v4  ;;  %v2790_v4 = vld [vmem:[#allocation5 + $0x318] sm:$0xff]  }
  0x5a   :  { %2476 = vmatpush3.bf16.msra.mxu1 %v2731_v5  ;;  %2483 = vmatprep.subr.bf16.mxu0 %v2736_v12  ;;  %v2791_v5 = vld [vmem:[#allocation5 + $0x398] sm:$0xff]   ;;  %v2798_v12 = vld [vmem:[#allocation5 + $0x308] sm:$0xff]  }
  0x5b   :  { %2505 = vmatprep.subr.bf16.mxu1 %v2737_v13  ;;  %v2799_v13 = vld [vmem:[#allocation5 + $0x388] sm:$0xff]  }
  0x5c   :  { %1794 = vmatmul.mubr.bf16.vlgmr.msra.gmra.mxu0 %v2183_v7  ;;  %v2793_v7 = vld [vmem:[#allocation5 + $0x3d0] sm:$0xff]  }
  0x5d   :  { %1834 = vmatmul.mubr.bf16.vlgmr.msra.gmra.mxu1 %v2185_v10  ;;  %2484 = vmatpush3.bf16.msra.mxu0 %v2738_v14  ;;  %v2796_v10 = vld [vmem:[#allocation5 + $0x348] sm:$0xff]   ;;  %v2800_v14 = vld [vmem:[#allocation5 + $0x340] sm:$0xff]  }
  0x5e   :  { %2506 = vmatpush3.bf16.msra.mxu1 %v2739_v15  ;;  %2485 = vmatprep.subr.bf16.mxu0 %v2740_v16  ;;  %v2801_v15 = vld [vmem:[#allocation5 + $0x3c0] sm:$0xff]  }
  0x5f   :  { %2507 = vmatprep.subr.bf16.mxu1 %v2741_v17  ;;  %1873 = vmatprep.mubr.bf16.mxu0 %v2188_v47  ;;  %v2802_v16 = vld [vmem:[#allocation5 + $0x300] sm:$0xff]   ;;  %v2831_v47 = vld [vmem:[#allocation5 + $0x490] sm:$0xff]  }
  0x60   :  { %1913 = vmatprep.mubr.bf16.mxu1 %v2190_v49  ;;  %v2803_v17 = vld [vmem:[#allocation5 + $0x380] sm:$0xff]   ;;  %v2833_v49 = vld [vmem:[#allocation5 + $0x4c8] sm:$0xff]  }
  0x61   :  { %2486 = vmatpush3.bf16.msra.mxu0 %v2742_v18  ;;  %v48_v18 = vld [vmem:[#allocation2 + $0x30] sm:$0xff] }
  0x62   :  { %2508 = vmatpush3.bf16.msra.mxu1 %v2743_v19  ;;  %2487 = vmatprep.subr.bf16.mxu0 %v2744_v20  ;;  %v49_v19 = vld [vmem:[#allocation2 + $0x38] sm:$0xff]  ;;  %v2191_v20 = vcombine.low %v48_v18, %v48_v18 }
  0x63   :  { %2509 = vmatprep.subr.bf16.mxu1 %v2745_v21  ;;  %v2192_v21 = vcombine.high %v48_v18, %v48_v18  ;;  %v2864_v18 = vld [vmem:[#allocation5 + $0x550] sm:$0xff]  }
  0x65   :  { %2488 = vmatpush3.bf16.msra.mxu0 %v2746_v22  ;;  %v2193_v22 = vcombine.low %v49_v19, %v49_v19 }
  0x66   :  { %2510 = vmatpush3.bf16.msra.mxu1 %v2747_v23  ;;  %2489 = vmatprep.subr.bf16.mxu0 %v2748_v24  ;;  %v2808_v23 = vld [vmem:[#allocation5 + $0x478] sm:$0xff]   ;;  %v2194_v24 = vcombine.high %v49_v19, %v49_v19  ;;  %v2865_v19 = vld [vmem:[#allocation5 + $0x5d0] sm:$0xff]  }
  0x67   :  { %2511 = vmatprep.subr.bf16.mxu1 %v2749_v25  ;;  %v2809_v25 = vld [vmem:[#allocation5 + $0x4f8] sm:$0xff]  }
  0x69   :  { %2490 = vmatpush3.bf16.msra.mxu0 %v2750_v26  ;;  %v2810_v26 = vld [vmem:[#allocation5 + $0x438] sm:$0xff]  }
  0x6a   :  { %2512 = vmatpush3.bf16.msra.mxu1 %v2751_v27  ;;  %2491 = vmatprep.subr.bf16.mxu0 %v2752_v28  ;;  %v2811_v27 = vld [vmem:[#allocation5 + $0x4b8] sm:$0xff]   ;;  %v2812_v28 = vld [vmem:[#allocation5 + $0x470] sm:$0xff]  }
  0x6b   :  { %2513 = vmatprep.subr.bf16.mxu1 %v2753_v29  ;;  %v2813_v29 = vld [vmem:[#allocation5 + $0x4f0] sm:$0xff]  }
  0x6d   :  { %2492 = vmatpush3.bf16.msra.mxu0 %v2754_v30  ;;  %v2814_v30 = vld [vmem:[#allocation5 + $0x430] sm:$0xff]  }
  0x6e   :  { %2514 = vmatpush3.bf16.msra.mxu1 %v2755_v31  ;;  %2493 = vmatprep.subr.bf16.mxu0 %v2756_v32  ;;  %v2815_v31 = vld [vmem:[#allocation5 + $0x4b0] sm:$0xff]   ;;  %v2816_v32 = vld [vmem:[#allocation5 + $0x468] sm:$0xff]  }
  0x6f   :  { %2515 = vmatprep.subr.bf16.mxu1 %v2757_v33  ;;  %v2817_v33 = vld [vmem:[#allocation5 + $0x4e8] sm:$0xff]  }
  0x71   :  { %2494 = vmatpush3.bf16.msra.mxu0 %v2758_v34  ;;  %v2818_v34 = vld [vmem:[#allocation5 + $0x428] sm:$0xff]  }
  0x72   :  { %2516 = vmatpush3.bf16.msra.mxu1 %v2759_v35  ;;  %2495 = vmatprep.subr.bf16.mxu0 %v2760_v36  ;;  %v2819_v35 = vld [vmem:[#allocation5 + $0x4a8] sm:$0xff]   ;;  %v2820_v36 = vld [vmem:[#allocation5 + $0x460] sm:$0xff]  }
  0x73   :  { %2517 = vmatprep.subr.bf16.mxu1 %v2761_v37  ;;  %v2821_v37 = vld [vmem:[#allocation5 + $0x4e0] sm:$0xff]  }
  0x75   :  { %2496 = vmatpush3.bf16.msra.mxu0 %v2762_v38  ;;  %v2822_v38 = vld [vmem:[#allocation5 + $0x420] sm:$0xff]  }
  0x76   :  { %2518 = vmatpush3.bf16.msra.mxu1 %v2763_v39  ;;  %2497 = vmatprep.subr.bf16.mxu0 %v2764_v40  ;;  %v2823_v39 = vld [vmem:[#allocation5 + $0x4a0] sm:$0xff]   ;;  %v2824_v40 = vld [vmem:[#allocation5 + $0x458] sm:$0xff]  }
  0x77   :  { %2519 = vmatprep.subr.bf16.mxu1 %v2765_v41  ;;  %v2825_v41 = vld [vmem:[#allocation5 + $0x4d8] sm:$0xff]  }
  0x79   :  { %2498 = vmatpush3.bf16.msra.mxu0 %v2766_v42  ;;  %v2826_v42 = vld [vmem:[#allocation5 + $0x418] sm:$0xff]  }
  0x7a   :  { %2520 = vmatpush3.bf16.msra.mxu1 %v2767_v43  ;;  %2527 = vmatprep.subr.bf16.mxu0 %v2772_v50  ;;  %v2827_v43 = vld [vmem:[#allocation5 + $0x498] sm:$0xff]   ;;  %v2834_v50 = vld [vmem:[#allocation5 + $0x408] sm:$0xff]  }
  0x7b   :  { %2549 = vmatprep.subr.bf16.mxu1 %v2773_v51  ;;  %v2835_v51 = vld [vmem:[#allocation5 + $0x488] sm:$0xff]  }
  0x7c   :  { %1874 = vmatmul.mubr.bf16.vlgmr.msra.gmra.mxu0 %v2187_v46  ;;  %v2830_v46 = vld [vmem:[#allocation5 + $0x410] sm:$0xff]  }
  0x7d   :  { %1914 = vmatmul.mubr.bf16.vlgmr.msra.gmra.mxu1 %v2189_v48  ;;  %2528 = vmatpush3.bf16.msra.mxu0 %v2774_v52  ;;  %v2832_v48 = vld [vmem:[#allocation5 + $0x448] sm:$0xff]   ;;  %v2836_v52 = vld [vmem:[#allocation5 + $0x440] sm:$0xff]  }
  0x7e   :  { %2550 = vmatpush3.bf16.msra.mxu1 %v2775_v53  ;;  %2529 = vmatprep.subr.bf16.mxu0 %v2776_v54  ;;  %v2837_v53 = vld [vmem:[#allocation5 + $0x4c0] sm:$0xff]  }
  0x7f   :  { %2551 = vmatprep.subr.bf16.mxu1 %v2777_v55  ;;  %1953 = vmatprep.mubr.bf16.mxu0 %v2192_v21  ;;  %v2838_v54 = vld [vmem:[#allocation5 + $0x400] sm:$0xff]   ;;  %v2867_v21 = vld [vmem:[#allocation5 + $0x590] sm:$0xff]  }
  0x80   :  { %1993 = vmatprep.mubr.bf16.mxu1 %v2194_v24  ;;  %v2839_v55 = vld [vmem:[#allocation5 + $0x480] sm:$0xff]   ;;  %v2870_v24 = vld [vmem:[#allocation5 + $0x508] sm:$0xff]  }
  0x81   :  { %2530 = vmatpush3.bf16.msra.mxu0 %v2778_v56  ;;  %v50_v56 = vld [vmem:[#allocation2 + $0x40] sm:$0xff] }
  0x82   :  { %2552 = vmatpush3.bf16.msra.mxu1 %v2779_v57  ;;  %2531 = vmatprep.subr.bf16.mxu0 %v2780_v58  ;;  %v2195_v57 = vcombine.low %v50_v56, %v50_v56  ;;  %v2196_v58 = vcombine.high %v50_v56, %v50_v56 }
  0x83   :  { %2553 = vmatprep.subr.bf16.mxu1 %v2781_v59  ;;  %v51_v59 = vld [vmem:[#allocation2 + $0x48] sm:$0xff] }
  0x85   :  { %2532 = vmatpush3.bf16.msra.mxu0 %v2782_v60  ;;  %v2197_v60 = vcombine.low %v51_v59, %v51_v59 }
  0x86   :  { %2554 = vmatpush3.bf16.msra.mxu1 %v2783_v61  ;;  %2533 = vmatprep.subr.bf16.mxu0 %v2784_v62  ;;  %v2198_v61 = vcombine.high %v51_v59, %v51_v59  ;;  %v2844_v62 = vld [vmem:[#allocation5 + $0x578] sm:$0xff]  }
  0x87   :  { %2555 = vmatprep.subr.bf16.mxu1 %v2785_v63  ;;  %v2845_v63 = vld [vmem:[#allocation5 + $0x5f8] sm:$0xff]  }
  0x89   :  { %2534 = vmatpush3.bf16.msra.mxu0 %v2786_v0  ;;  %v2846_v0 = vld [vmem:[#allocation5 + $0x538] sm:$0xff]  }
  0x8a   :  { %2556 = vmatpush3.bf16.msra.mxu1 %v2787_v1  ;;  %2535 = vmatprep.subr.bf16.mxu0 %v2788_v2  ;;  %v2847_v1 = vld [vmem:[#allocation5 + $0x5b8] sm:$0xff]   ;;  %v2848_v2 = vld [vmem:[#allocation5 + $0x570] sm:$0xff]  }
  0x8b   :  { %2557 = vmatprep.subr.bf16.mxu1 %v2789_v3  ;;  %v2849_v3 = vld [vmem:[#allocation5 + $0x5f0] sm:$0xff]  }
  0x8d   :  { %2536 = vmatpush3.bf16.msra.mxu0 %v2790_v4  ;;  %v2850_v4 = vld [vmem:[#allocation5 + $0x530] sm:$0xff]  }
  0x8e   :  { %2558 = vmatpush3.bf16.msra.mxu1 %v2791_v5  ;;  %2537 = vmatprep.subr.bf16.mxu0 %v2792_v6  ;;  %v2851_v5 = vld [vmem:[#allocation5 + $0x5b0] sm:$0xff]   ;;  %v2852_v6 = vld [vmem:[#allocation5 + $0x568] sm:$0xff]  }
  0x8f   :  { %2559 = vmatprep.subr.bf16.mxu1 %v2793_v7  ;;  %v2853_v7 = vld [vmem:[#allocation5 + $0x5e8] sm:$0xff]  }
  0x91   :  { %2538 = vmatpush3.bf16.msra.mxu0 %v2794_v8  ;;  %v2854_v8 = vld [vmem:[#allocation5 + $0x528] sm:$0xff]  }
  0x92   :  { %2560 = vmatpush3.bf16.msra.mxu1 %v2795_v9  ;;  %2539 = vmatprep.subr.bf16.mxu0 %v2796_v10  ;;  %v2855_v9 = vld [vmem:[#allocation5 + $0x5a8] sm:$0xff]   ;;  %v2856_v10 = vld [vmem:[#allocation5 + $0x560] sm:$0xff]  }
  0x93   :  { %2561 = vmatprep.subr.bf16.mxu1 %v2797_v11  ;;  %v2857_v11 = vld [vmem:[#allocation5 + $0x5e0] sm:$0xff]  }
  0x95   :  { %2540 = vmatpush3.bf16.msra.mxu0 %v2798_v12  ;;  %v2858_v12 = vld [vmem:[#allocation5 + $0x520] sm:$0xff]  }
  0x96   :  { %2562 = vmatpush3.bf16.msra.mxu1 %v2799_v13  ;;  %2541 = vmatprep.subr.bf16.mxu0 %v2800_v14  ;;  %v2859_v13 = vld [vmem:[#allocation5 + $0x5a0] sm:$0xff]   ;;  %v2860_v14 = vld [vmem:[#allocation5 + $0x558] sm:$0xff]  }
  0x97   :  { %2563 = vmatprep.subr.bf16.mxu1 %v2801_v15  ;;  %v2861_v15 = vld [vmem:[#allocation5 + $0x5d8] sm:$0xff]  }
  0x99   :  { %2542 = vmatpush3.bf16.msra.mxu0 %v2802_v16  ;;  %v2862_v16 = vld [vmem:[#allocation5 + $0x518] sm:$0xff]  }
  0x9a   :  { %2564 = vmatpush3.bf16.msra.mxu1 %v2803_v17  ;;  %2571 = vmatprep.subr.bf16.mxu0 %v2808_v23  ;;  %v2863_v17 = vld [vmem:[#allocation5 + $0x598] sm:$0xff]   ;;  %v2869_v23 = vld [vmem:[#allocation5 + $0x5c8] sm:$0xff]  }
  0x9b   :  { %2593 = vmatprep.subr.bf16.mxu1 %v2809_v25  ;;  %v2871_v25 = vld [vmem:[#allocation5 + $0x588] sm:$0xff]  }
  0x9c   :  { %1954 = vmatmul.mubr.bf16.vlgmr.msra.gmra.mxu0 %v2191_v20  ;;  %v2866_v20 = vld [vmem:[#allocation5 + $0x510] sm:$0xff]  }
  0x9d   :  { %1994 = vmatmul.mubr.bf16.vlgmr.msra.gmra.mxu1 %v2193_v22  ;;  %2572 = vmatpush3.bf16.msra.mxu0 %v2810_v26  ;;  %v2868_v22 = vld [vmem:[#allocation5 + $0x548] sm:$0xff]   ;;  %v2872_v26 = vld [vmem:[#allocation5 + $0x540] sm:$0xff]  }
  0x9e   :  { %2594 = vmatpush3.bf16.msra.mxu1 %v2811_v27  ;;  %2573 = vmatprep.subr.bf16.mxu0 %v2812_v28  ;;  %v2873_v27 = vld [vmem:[#allocation5 + $0x5c0] sm:$0xff]  }
  0x9f   :  { %2595 = vmatprep.subr.bf16.mxu1 %v2813_v29  ;;  %2033 = vmatprep.mubr.bf16.mxu0 %v2196_v58  ;;  %v2874_v28 = vld [vmem:[#allocation5 + $0x500] sm:$0xff]  }
  0xa0   :  { %2073 = vmatprep.mubr.bf16.mxu1 %v2198_v61  ;;  %v2875_v29 = vld [vmem:[#allocation5 + $0x580] sm:$0xff]  }
  0xa1   :  { %2574 = vmatpush3.bf16.msra.mxu0 %v2814_v30  ;;  %v52_v30 = vld [vmem:[#allocation2 + $0x50] sm:$0xff] }
  0xa2   :  { %2596 = vmatpush3.bf16.msra.mxu1 %v2815_v31  ;;  %2575 = vmatprep.subr.bf16.mxu0 %v2816_v32  ;;  %v53_v31 = vld [vmem:[#allocation2 + $0x58] sm:$0xff]  ;;  %v2199_v32 = vcombine.low %v52_v30, %v52_v30 }
  0xa3   :  { %2597 = vmatprep.subr.bf16.mxu1 %v2817_v33  ;;  %v2200_v33 = vcombine.high %v52_v30, %v52_v30 }
  0xa5   :  { %2576 = vmatpush3.bf16.msra.mxu0 %v2818_v34  ;;  %v2201_v34 = vcombine.low %v53_v31, %v53_v31 }
  0xa6   :  { %2598 = vmatpush3.bf16.msra.mxu1 %v2819_v35  ;;  %2577 = vmatprep.subr.bf16.mxu0 %v2820_v36  ;;  %v2202_v35 = vcombine.high %v53_v31, %v53_v31 }
  0xa7   :  { %2599 = vmatprep.subr.bf16.mxu1 %v2821_v37 }
  0xa9   :  { %2578 = vmatpush3.bf16.msra.mxu0 %v2822_v38  ;;  %v2178_v38 = vld [vmem:[%s2985_s2] ss:$0 sm:$0xff]  ;;  %s2950_s2 = smov [#allocation7]  }
  0xaa   :  { %2600 = vmatpush3.bf16.msra.mxu1 %v2823_v39  ;;  %2579 = vmatprep.subr.bf16.mxu0 %v2824_v40  ;;  %s2168_s24 = sshll.u32 %s2950_s2, 4  ;;  %s2169_s24 = int_to_ptr.vmem [resolvable:$true] %s2168_s24 }
  0xab   :  { %2601 = vmatprep.subr.bf16.mxu1 %v2825_v41  ;;  %s2920_s25 = scalar_lea.vmem %s2169_s24, 128  ;;  %p2925_p11 = scmp.lt.s32.totalorder %s2169_s24, %s2169_s24 }
  0xac   :  { %p2921_p10 = scmp.ne.s32.totalorder %s2169_s24, %s2920_s25  ;;  %p2926_p12 = scmp.lt.s32.totalorder %s2920_s25, %s2920_s25 }
  0xad   :  { %2580 = vmatpush3.bf16.msra.mxu0 %v2826_v42 }
  0xae   :  { %2602 = vmatpush3.bf16.msra.mxu1 %v2827_v43  ;;  %2581 = vmatprep.subr.bf16.mxu0 %v2828_v44  ;;  %p2927_p13 = por %p2926_p12, %p2925_p11 }
  0xaf   :  { %2603 = vmatprep.subr.bf16.mxu1 %v2829_v45 }
  0xb0   :  { %p2928_p0 = pnand %p2927_p13, %p2921_p10 }
  0xb1   :  { %2582 = vmatpush3.bf16.msra.mxu0 %v2830_v46 }
  0xb2   :  { %2604 = vmatpush3.bf16.msra.mxu1 %v2831_v47  ;;  %2583 = vmatprep.subr.bf16.mxu0 %v2832_v48 }
  0xb3   :  { %2605 = vmatprep.subr.bf16.mxu1 %v2833_v49 }
  0xb5   :  { %2584 = vmatpush3.bf16.msra.mxu0 %v2834_v50 }
  0xb6   :  { %2606 = vmatpush3.bf16.msra.mxu1 %v2835_v51  ;;  %2585 = vmatprep.subr.bf16.mxu0 %v2836_v52 }
  0xb7   :  { %2607 = vmatprep.subr.bf16.mxu1 %v2837_v53 }
  0xb9   :  { %2586 = vmatpush3.bf16.msra.mxu0 %v2838_v54 }
  0xba   :  { %2608 = vmatpush3.bf16.msra.mxu1 %v2839_v55  ;;  %2615 = vmatprep.subr.bf16.mxu0 %v2844_v62 }
  0xbb   :  { %2637 = vmatprep.subr.bf16.mxu1 %v2845_v63 }
  0xbc   :  { %2034 = vmatmul.mubr.bf16.vlgmr.msra.gmra.mxu0 %v2195_v57 }
  0xbd   :  { %2074 = vmatmul.mubr.bf16.vlgmr.msra.gmra.mxu1 %v2197_v60  ;;  %2616 = vmatpush3.bf16.msra.mxu0 %v2846_v0 }
  0xbe   :  { %2638 = vmatpush3.bf16.msra.mxu1 %v2847_v1  ;;  %2617 = vmatprep.subr.bf16.mxu0 %v2848_v2 }
  0xbf   :  { %2639 = vmatprep.subr.bf16.mxu1 %v2849_v3  ;;  %2113 = vmatprep.mubr.bf16.mxu0 %v2200_v33 }
  0xc0   :  { %2153 = vmatprep.mubr.bf16.mxu1 %v2202_v35 }
  0xc1   :  { %2618 = vmatpush3.bf16.msra.mxu0 %v2850_v4 }
  0xc2   :  { %2640 = vmatpush3.bf16.msra.mxu1 %v2851_v5  ;;  %2619 = vmatprep.subr.bf16.mxu0 %v2852_v6 }
  0xc3   :  { %2641 = vmatprep.subr.bf16.mxu1 %v2853_v7 }
  0xc5   :  { %2620 = vmatpush3.bf16.msra.mxu0 %v2854_v8 }
  0xc6   :  { %2642 = vmatpush3.bf16.msra.mxu1 %v2855_v9  ;;  %2621 = vmatprep.subr.bf16.mxu0 %v2856_v10 }
  0xc7   :  { %2643 = vmatprep.subr.bf16.mxu1 %v2857_v11 }
  0xc9   :  { %2622 = vmatpush3.bf16.msra.mxu0 %v2858_v12 }
  0xca   :  { %2644 = vmatpush3.bf16.msra.mxu1 %v2859_v13  ;;  %2623 = vmatprep.subr.bf16.mxu0 %v2860_v14 }
  0xcb   :  { %2645 = vmatprep.subr.bf16.mxu1 %v2861_v15 }
  0xcd   :  { %2624 = vmatpush3.bf16.msra.mxu0 %v2862_v16 }
  0xce   :  { %2646 = vmatpush3.bf16.msra.mxu1 %v2863_v17  ;;  %2625 = vmatprep.subr.bf16.mxu0 %v2864_v18 }
  0xcf   :  { %2647 = vmatprep.subr.bf16.mxu1 %v2865_v19 }
  0xd1   :  { %2626 = vmatpush3.bf16.msra.mxu0 %v2866_v20 }
  0xd2   :  { %2648 = vmatpush3.bf16.msra.mxu1 %v2867_v21  ;;  %2627 = vmatprep.subr.bf16.mxu0 %v2868_v22 }
  0xd3   :  { %2649 = vmatprep.subr.bf16.mxu1 %v2869_v23 }
  0xd5   :  { %2628 = vmatpush3.bf16.msra.mxu0 %v2870_v24 }
  0xd6   :  { %2650 = vmatpush3.bf16.msra.mxu1 %v2871_v25  ;;  %2629 = vmatprep.subr.bf16.mxu0 %v2872_v26 }
  0xd7   :  { %2651 = vmatprep.subr.bf16.mxu1 %v2873_v27 }
  0xd9   :  { %2630 = vmatpush3.bf16.msra.mxu0 %v2874_v28 }
  0xda   :  { %2652 = vmatpush3.bf16.msra.mxu1 %v2875_v29 }
  0xdc   :  { %2114 = vmatmul.mubr.bf16.vlgmr.msra.gmra.mxu0 %v2199_v32 }
  0xdd   :  { %2154 = vmatmul.mubr.bf16.vlgmr.msra.gmra.mxu1 %v2201_v34 }
  0xfc   :  { %v2411_v36 = vpop.f32.mrf.mxu0 }
  0xfd   :  { %v2433_v37 = vpop.f32.mrf.mxu1 }
  0xfe   :  { %v2412_v39 = vpop.f32.mrf.mxu0 }
  0xff   :  { %v2434_v40 = vpop.f32.mrf.mxu1  ;;  %v2413_v41 = vadd.f32 %v2412_v39, %v2411_v36 }
 0x100   :  { %v2435_v42 = vadd.f32 %v2434_v40, %v2433_v37  ;;  %v2414_v43 = vpop.f32.mrf.mxu0 }
 0x101   :  { %v2436_v44 = vpop.f32.mrf.mxu1  ;;  %v1716_v45 = vadd.f32 %v2413_v41, %v2178_v38 }
 0x102   :  { %v2415_v46 = vpop.f32.mrf.mxu0 }
 0x103   :  { %v2437_v47 = vpop.f32.mrf.mxu1  ;;  %v1756_v48 = vadd.f32 %v2435_v42, %v1716_v45 }
 0x11c   :  { %v2455_v49 = vpop.f32.mrf.mxu0 }
 0x11d   :  { %v2477_v50 = vpop.f32.mrf.mxu1 }
 0x11e   :  { %v2456_v51 = vpop.f32.mrf.mxu0 }
 0x11f   :  { %v2478_v52 = vpop.f32.mrf.mxu1  ;;  %v2457_v53 = vadd.f32 %v2456_v51, %v2455_v49 }
 0x120   :  { %v2479_v54 = vadd.f32 %v2478_v52, %v2477_v50  ;;  %v2458_v55 = vpop.f32.mrf.mxu0 }
 0x121   :  { %v2480_v56 = vpop.f32.mrf.mxu1  ;;  %v1796_v57 = vadd.f32 %v2457_v53, %v1756_v48 }
 0x122   :  { %v2459_v58 = vpop.f32.mrf.mxu0 }
 0x123   :  { %v2481_v59 = vpop.f32.mrf.mxu1  ;;  %v1836_v60 = vadd.f32 %v2479_v54, %v1796_v57 }
 0x13c   :  { %v2499_v61 = vpop.f32.mrf.mxu0 }
 0x13d   :  { %v2521_v62 = vpop.f32.mrf.mxu1 }
 0x13e   :  { %v2500_v63 = vpop.f32.mrf.mxu0 }
 0x13f   :  { %v2501_v0 = vadd.f32 %v2500_v63, %v2499_v61  ;;  %v2522_v1 = vpop.f32.mrf.mxu1 }
 0x140   :  { %v2523_v2 = vadd.f32 %v2522_v1, %v2521_v62  ;;  %v2502_v3 = vpop.f32.mrf.mxu0 }
 0x141   :  { %v1876_v4 = vadd.f32 %v2501_v0, %v1836_v60  ;;  %v2524_v5 = vpop.f32.mrf.mxu1 }
 0x142   :  { %v2503_v6 = vpop.f32.mrf.mxu0 }
 0x143   :  { %v1916_v7 = vadd.f32 %v2523_v2, %v1876_v4  ;;  %v2525_v8 = vpop.f32.mrf.mxu1 }
 0x15c   :  { %v2543_v9 = vpop.f32.mrf.mxu0 }
 0x15d   :  { %v2565_v10 = vpop.f32.mrf.mxu1 }
 0x15e   :  { %v2544_v11 = vpop.f32.mrf.mxu0 }
 0x15f   :  { %v2566_v12 = vpop.f32.mrf.mxu1  ;;  %v2545_v25 = vadd.f32 %v2544_v11, %v2543_v9 }
 0x160   :  { %v2546_v13 = vpop.f32.mrf.mxu0  ;;  %v2567_v27 = vadd.f32 %v2566_v12, %v2565_v10 }
 0x161   :  { %v2568_v14 = vpop.f32.mrf.mxu1  ;;  %v1956_v26 = vadd.f32 %v2545_v25, %v1916_v7 }
 0x162   :  { %v2547_v15 = vpop.f32.mrf.mxu0 }
 0x163   :  { %v2569_v16 = vpop.f32.mrf.mxu1  ;;  %v1996_v29 = vadd.f32 %v2567_v27, %v1956_v26 }
 0x17c   :  { %v2587_v17 = vpop.f32.mrf.mxu0 }
 0x17d   :  { %v2609_v18 = vpop.f32.mrf.mxu1 }
 0x17e   :  { %v2588_v19 = vpop.f32.mrf.mxu0 }
 0x17f   :  { %v2610_v20 = vpop.f32.mrf.mxu1  ;;  %v2589_v28 = vadd.f32 %v2588_v19, %v2587_v17 }
 0x180   :  { %v2590_v21 = vpop.f32.mrf.mxu0  ;;  %v2611_v31 = vadd.f32 %v2610_v20, %v2609_v18 }
 0x181   :  { %v2612_v22 = vpop.f32.mrf.mxu1  ;;  %v2036_v30 = vadd.f32 %v2589_v28, %v1996_v29 }
 0x182   :  { %v2591_v23 = vpop.f32.mrf.mxu0 }
 0x183   :  { %v2613_v24 = vpop.f32.mrf.mxu1  ;;  %v2076_v35 = vadd.f32 %v2611_v31, %v2036_v30 }
 0x19c   :  { %v2631_v32 = vpop.f32.mrf.mxu0 }
 0x19d   :  { %v2653_v33 = vpop.f32.mrf.mxu1 }
 0x19e   :  { %v2632_v34 = vpop.f32.mrf.mxu0 }
 0x19f   :  { %v2633_v36 = vadd.f32 %v2632_v34, %v2631_v32  ;;  %v2654_v37 = vpop.f32.mrf.mxu1 }
 0x1a0   :  { %v2634_v38 = vpop.f32.mrf.mxu0  ;;  %v2655_v40 = vadd.f32 %v2654_v37, %v2653_v33 }
 0x1a1   :  { %v2116_v39 = vadd.f32 %v2633_v36, %v2076_v35  ;;  %v2656_v41 = vpop.f32.mrf.mxu1 }
 0x1a2   :  { %v2635_v42 = vpop.f32.mrf.mxu0 }
 0x1a3   :  { %v2156_v43 = vadd.f32 %v2655_v40, %v2116_v39  ;;  %v2657_v44 = vpop.f32.mrf.mxu1 }
 0x1a5   :  { %2161 = vst [vmem:[#allocation7] sm:$0xff] %v2156_v43 }
 0x1a6   :  { %2931 = shalt.err (!%p2928_p0)
}
 0x1a7   :  { %2171 = dma.vmem_to_hbm [thread:$0]  %s2169_s24, 128, %s2986_s3, [#allocation4]  }
 0x1a8   :  { %2944 = dma.done.wait [#allocation4], 128  }
 0x1a9   :  { %2945 = vsyncadd [#allocation4], 4294967168 }
 0x1aa   :  { %2175 = vsyncpa [#allocation3], 1 }
 0x1ab   :  { %2176 = vsyncpa [#allocation6], 1 }
 0x1ac   :  { %2177 = vsyncpa [#allocation4], 1 }

</bundles_post_ra>
